<compile_context>
chip_gen: v7x
topology: tpu7x:2x2x1
jax: 0.10.0
libtpu: 0.0.40
codegen_flags: <defaults>
</compile_context>

<pallas_src>
import jax
import jax.numpy as jnp
from jax.experimental import pallas as pl
from jax.experimental.pallas import tpu as pltpu

_LANE = 128
_COL_CANDIDATES = (8192, 4096, 2048, 1024, 512, 256, 128)
_PER_BLOCK_BYTES = 2 * 1024 * 1024  # per-array block; 3 arrays x 2 buffers = 12 MiB


def _eltwise_sum_kernel(x_ref, y_ref, o_ref):
    # Pure VPU elementwise add; promotion stays in-register, never in HBM.
    o_ref[...] = x_ref[...].astype(o_ref.dtype) + y_ref[...].astype(o_ref.dtype)


def _sublane_multiple(dtype) -> int:
    isz = jnp.dtype(dtype).itemsize
    if isz >= 4:
        return 8
    return 8 * (4 // isz)  # 16 for 2-byte (bf16/fp16), 32 for 1-byte (int8/fp8)


def _round_up(a: int, m: int) -> int:
    return -(-a // m) * m


def eltwise_sum(x: jax.Array, y: jax.Array) -> jax.Array:
    """Elementwise sum with the semantics of torch.add(x, y)."""
    out_shape = tuple(jnp.broadcast_shapes(x.shape, y.shape))
    out_dtype = jnp.result_type(x.dtype, y.dtype)
    # TODO(synk): jnp.result_type can differ from torch promotion for exotic mixed
    # int/float combos; identical-dtype inputs (the common case) are exact.

    # Broadcasting glue only when shapes actually differ (rare for this module).
    if x.shape != out_shape:
        x = jnp.broadcast_to(x, out_shape)
    if y.shape != out_shape:
        y = jnp.broadcast_to(y, out_shape)

    total = 1
    for d in out_shape:
        total *= int(d)
    if total == 0:
        return jnp.zeros(out_shape, out_dtype)

    sub = max(_sublane_multiple(x.dtype), _sublane_multiple(y.dtype),
              _sublane_multiple(out_dtype))

    # ---- lane-dense 2D layout: (rows, cols), cols a multiple of 128 --------------
    cols = None
    # Tier 1: no padding and rows a clean multiple of the sublane pack.
    for c in _COL_CANDIDATES:
        if total % (c * sub) == 0:
            cols = c
            break
    # Tier 2: no padding at all (partial edge row-blocks are masked by Pallas).
    if cols is None:
        for c in _COL_CANDIDATES:
            if total % c == 0:
                cols = c
                break
    # Tier 3: padding needed; pick the widest lane span we can still fill.
    if cols is None:
        for c in _COL_CANDIDATES:
            if total >= c * sub:
                cols = c
                break
        else:
            cols = _LANE

    rows = pl.cdiv(total, cols)
    padded_total = rows * cols
    pad = padded_total - total

    xf = x.reshape(total)              # contiguous reshape: no copy
    yf = y.reshape(total)
    if pad:
        xf = jnp.concatenate([xf, jnp.zeros((pad,), xf.dtype)])
        yf = jnp.concatenate([yf, jnp.zeros((pad,), yf.dtype)])
    x2 = xf.reshape(rows, cols)
    y2 = yf.reshape(rows, cols)

    # ---- byte-budgeted row tiling --------------------------------------------------
    max_itemsize = max(jnp.dtype(x.dtype).itemsize, jnp.dtype(y.dtype).itemsize,
                       jnp.dtype(out_dtype).itemsize)
    bytes_per_row = cols * max_itemsize

    if rows <= sub:
        tile_rows = rows                                   # one full-height block
    else:
        tile_rows = max(sub, (_PER_BLOCK_BYTES // bytes_per_row) // sub * sub)
        tile_rows = min(tile_rows, rows)                   # == rows ok (full dim)

    grid_n = pl.cdiv(rows, tile_rows)
    # Give both of v7x's TensorCores work when the whole slab fit in one block.
    if grid_n == 1 and rows >= 2 * sub:
        tile_rows = _round_up(pl.cdiv(rows, 2), sub)
        grid_n = pl.cdiv(rows, tile_rows)

    bytes_accessed = (x2.size * x2.dtype.itemsize
                      + y2.size * y2.dtype.itemsize
                      + padded_total * jnp.dtype(out_dtype).itemsize)

    out2d = pl.pallas_call(
        _eltwise_sum_kernel,
        out_shape=jax.ShapeDtypeStruct((rows, cols), out_dtype),
        grid_spec=pltpu.PrefetchScalarGridSpec(
            num_scalar_prefetch=0,
            grid=(grid_n,),
            in_specs=[
                pl.BlockSpec((tile_rows, cols), lambda i: (i, 0)),
                pl.BlockSpec((tile_rows, cols), lambda i: (i, 0)),
            ],
            out_specs=pl.BlockSpec((tile_rows, cols), lambda i: (i, 0)),
        ),
        compiler_params=pltpu.CompilerParams(
            dimension_semantics=("parallel",),
            vmem_limit_bytes=32 * 1024 * 1024,
        ),
        cost_estimate=pl.CostEstimate(
            flops=total, transcendentals=0, bytes_accessed=bytes_accessed),
    )(x2, y2)

    out_flat = out2d.reshape(padded_total)
    if pad:
        out_flat = out_flat[:total]    # drop padded tail before exposing output
    return out_flat.reshape(out_shape)


if __name__ == "__main__":
    key = jax.random.PRNGKey(0)
    kx, ky = jax.random.split(key)
    # NCHW-shaped inputs consistent with a conv-style feature map.
    x = jax.random.normal(kx, (2, 4, 16, 16), dtype=jnp.float32)
    y = jax.random.normal(ky, (2, 4, 16, 16), dtype=jnp.float32)

    out = eltwise_sum(x, y)
    jax.block_until_ready(out)

    ref = x + y
    assert out.shape == ref.shape and out.dtype == ref.dtype
    assert jnp.allclose(out, ref, atol=1e-6, rtol=1e-6)

    print("KERNEL_OK")
</pallas_src>

<mosaic_0001>
module attributes {stable_mosaic.version = 11 : i64} {
  func.func @_eltwise_sum_kernel(%arg0: i32, %arg1: memref<8x256xf32, #tpu.memory_space<vmem>>, %arg2: memref<8x256xf32, #tpu.memory_space<vmem>>, %arg3: memref<8x256xf32, #tpu.memory_space<vmem>>) attributes {dimension_semantics = [#tpu.dimension_semantics<parallel>], iteration_bounds = array<i64: 1>, scalar_prefetch = 0 : i64, scratch_operands = 0 : i64, tpu.core_type = #tpu.core_type<tc>, window_params = [{transform_indices = @transform_0, window_bounds = array<i64: 8, 256>}, {transform_indices = @transform_1, window_bounds = array<i64: 8, 256>}, {transform_indices = @transform_2, window_bounds = array<i64: 8, 256>}]} {
    %c0 = arith.constant 0 : index
    %c0_0 = arith.constant 0 : index
    %0 = vector.load %arg1[%c0, %c0_0] : memref<8x256xf32, #tpu.memory_space<vmem>>, vector<8x256xf32>
    %c0_1 = arith.constant 0 : index
    %c0_2 = arith.constant 0 : index
    %1 = vector.load %arg2[%c0_1, %c0_2] : memref<8x256xf32, #tpu.memory_space<vmem>>, vector<8x256xf32>
    %2 = arith.addf %0, %1 : vector<8x256xf32>
    %c0_3 = arith.constant 0 : index
    %c0_4 = arith.constant 0 : index
    %3 = vector.load %arg3[%c0_3, %c0_4] : memref<8x256xf32, #tpu.memory_space<vmem>>, vector<8x256xf32>
    tpu.vector_store %arg3[%c0_3, %c0_4], %2 {strides = array<i32>} : memref<8x256xf32, #tpu.memory_space<vmem>>, vector<8x256xf32>,
    return
  }
  func.func @transform_0(%arg0: i32) -> (i32, i32) {
    %c0_i32 = arith.constant 0 : i32
    %c0_i32_0 = arith.constant 0 : i32
    return %arg0, %c0_i32 : i32, i32
  }
  func.func @transform_1(%arg0: i32) -> (i32, i32) {
    %c0_i32 = arith.constant 0 : i32
    %c0_i32_0 = arith.constant 0 : i32
    return %arg0, %c0_i32 : i32, i32
  }
  func.func @transform_2(%arg0: i32) -> (i32, i32) {
    %c0_i32 = arith.constant 0 : i32
    %c0_i32_0 = arith.constant 0 : i32
    return %arg0, %c0_i32 : i32, i32
  }
}

</mosaic_0001>

<bundles_post_ra>
// kernel: tpu_custom_call.1
= control target key start
LH: loop header
LB: loop body
LE: loop exit
PB: predicated region body
PF: predicated region fallthrough
CT: control target
= control target key end

     0   :  { %7 = vsyncpa [#allocation3], 0  ;;  %s189_s0 = inlined_call_operand.hbm [shape: f32[8,256], index: 0, kind: input, shape index: {}]   ;;  %s190_s1 = inlined_call_operand.hbm [shape: f32[8,256], index: 1, kind: input, shape index: {}]   ;;  %s191_s2 = inlined_call_operand.hbm [shape: f32[8,256], index: 2, kind: output, shape index: {}]  }
   0x1   :  { %8 = vsyncpa [#allocation6], 0 }
   0x2   :  { %9 = vsyncpa [#allocation4], 0  ;;  %s135_s9 = smov [#allocation2]   ;;  %s136_s11 = smov [#allocation5]  }
   0x3   :  { %s16_s10 = sshll.u32 %s135_s9, 4  ;;  %s26_s12 = sshll.u32 %s136_s11, 4  ;;  %s17_s10 = int_to_ptr.vmem [resolvable:$true] %s16_s10  ;;  %s27_s12 = int_to_ptr.vmem [resolvable:$true] %s26_s12 }
   0x4   :  { %s63_s15 = scalar_lea.hbm %s189_s0, 256 }
   0x5   :  { %p64_p0 = scmp.ne.s32.totalorder %s189_s0, %s63_s15  ;;  %p67_p1 = scmp.lt.u32.totalorder %s63_s15, %s189_s0 }
   0x7   :  { %p69_p2 = pnand %p67_p1, %p64_p0 }
   0x9   :  { %72 = shalt.err (!%p69_p2)
}
   0xa   :  { %s73_s20 = scalar_lea.vmem %s17_s10, 256  ;;  %p78_p4 = scmp.lt.s32.totalorder %s17_s10, %s17_s10 }
   0xb   :  { %p74_p3 = scmp.ne.s32.totalorder %s17_s10, %s73_s20  ;;  %p79_p5 = scmp.lt.s32.totalorder %s73_s20, %s73_s20 }
   0xd   :  { %p80_p6 = por %p79_p5, %p78_p4 }
   0xf   :  { %p81_p7 = pnand %p80_p6, %p74_p3 }
  0x11   :  { %84 = shalt.err (!%p81_p7)
}
  0x12   :  { %19 = dma.hbm_to_vmem [thread:$0]  %s189_s0, 256, %s17_s10, [#allocation3]  }
  0x13   :  { %s85_s25 = scalar_lea.hbm %s190_s1, 256 }
  0x14   :  { %p86_p8 = scmp.ne.s32.totalorder %s190_s1, %s85_s25  ;;  %p89_p9 = scmp.lt.u32.totalorder %s85_s25, %s190_s1 }
  0x16   :  { %p91_p10 = pnand %p89_p9, %p86_p8 }
  0x18   :  { %94 = shalt.err (!%p91_p10)
}
  0x19   :  { %s95_s30 = scalar_lea.vmem %s27_s12, 256  ;;  %p100_p12 = scmp.lt.s32.totalorder %s27_s12, %s27_s12 }
  0x1a   :  { %p96_p11 = scmp.ne.s32.totalorder %s27_s12, %s95_s30  ;;  %p101_p13 = scmp.lt.s32.totalorder %s95_s30, %s95_s30 }
  0x1c   :  { %p102_p0 = por %p101_p13, %p100_p12 }
  0x1e   :  { %p103_p1 = pnand %p102_p0, %p96_p11 }
  0x20   :  { %106 = shalt.err (!%p103_p1)
}
  0x21   :  { %29 = dma.hbm_to_vmem [thread:$0]  %s190_s1, 256, %s27_s12, [#allocation6]  }
  0x22   :  { %129 = dma.done.wait [#allocation3], 256  }
  0x23   :  { %130 = vsyncadd [#allocation3], 4294967040 }
  0x24   :  { %131 = dma.done.wait [#allocation6], 256  }
  0x25   :  { %132 = vsyncadd [#allocation6], 4294967040  ;;  %s137_s4 = smov [#allocation7]   ;;  %v36_v0 = vld [vmem:[#allocation2] sm:$0xff]  ;;  %v38_v1 = vld [vmem:[#allocation5] sm:$0xff] }
  0x26   :  { %s50_s5 = sshll.u32 %s137_s4, 4  ;;  %v37_v2 = vld [vmem:[#allocation2 + $0x8] sm:$0xff]  ;;  %v40_v3 = vadd.f32 %v38_v1, %v36_v0  ;;  %v39_v4 = vld [vmem:[#allocation5 + $0x8] sm:$0xff]  ;;  %s51_s5 = int_to_ptr.vmem [resolvable:$true] %s50_s5 }
  0x27   :  { %v41_v5 = vadd.f32 %v39_v4, %v37_v2  ;;  %s107_s6 = scalar_lea.vmem %s51_s5, 256  ;;  %p112_p3 = scmp.lt.s32.totalorder %s51_s5, %s51_s5 }
  0x28   :  { %42 = vst [vmem:[#allocation7] sm:$0xff] %v40_v3  ;;  %p108_p2 = scmp.ne.s32.totalorder %s51_s5, %s107_s6  ;;  %p113_p4 = scmp.lt.s32.totalorder %s107_s6, %s107_s6 }
  0x29   :  { %43 = vst [vmem:[#allocation7 + $0x8] sm:$0xff] %v41_v5 }
  0x2a   :  { %p114_p5 = por %p113_p4, %p112_p3 }
  0x2c   :  { %p115_p6 = pnand %p114_p5, %p108_p2 }
  0x2e   :  { %118 = shalt.err (!%p115_p6)
}
  0x2f   :  { %s119_s8 = scalar_lea.hbm %s191_s2, 256 }
  0x30   :  { %p120_p7 = scmp.ne.s32.totalorder %s191_s2, %s119_s8  ;;  %p123_p8 = scmp.lt.u32.totalorder %s119_s8, %s191_s2 }
  0x32   :  { %p125_p9 = pnand %p123_p8, %p120_p7 }
  0x34   :  { %128 = shalt.err (!%p125_p9)
}
  0x35   :  { %53 = dma.vmem_to_hbm [thread:$0]  %s51_s5, 256, %s191_s2, [#allocation4]  }
  0x36   :  { %133 = dma.done.wait [#allocation4], 256  }
  0x37   :  { %134 = vsyncadd [#allocation4], 4294967040 }
  0x38   :  { %57 = vsyncpa [#allocation3], 1 }
  0x39   :  { %58 = vsyncpa [#allocation6], 1 }
  0x3a   :  { %59 = vsyncpa [#allocation4], 1 }

</bundles_post_ra>
